<compile_context>
chip_gen: v5e
topology: v5e:2x2
jax: 0.10.0
libtpu: 0.0.40
codegen_flags: <defaults>
</compile_context>

<pallas_src>
import jax
import jax.numpy as jnp
from jax.experimental import pallas as pl
from jax.experimental.pallas import tpu as pltpu

EPS = 1e-5
LANES = 128
SUBLANES = 8
MAX_TILE_ROWS = 1024  # 1024 * 128 * 4B = 512 KiB per input per pipeline buffer


def _round_up(x, m):
    return ((x + m - 1) // m) * m


def _make_kernel(tile_rows, blocks_per_shard):
    r8 = tile_rows // SUBLANES

    def kernel(nrows_ref, pred_ref, gt_ref, sum_ref, cnt_ref, acc_sum, acc_cnt):
        c = pl.program_id(0)  # parallel shard (maps to TensorCores on v7x)
        j = pl.program_id(1)  # sequential reduction axis

        @pl.when(j == 0)
        def _():
            acc_sum[...] = jnp.zeros_like(acc_sum)
            acc_cnt[...] = jnp.zeros_like(acc_cnt)

        gt = gt_ref[...].astype(jnp.float32)
        pred = pred_ref[...].astype(jnp.float32)

        # Global row index of every element in this block.  Rows >= nrows are
        # block overhang (undefined data) and must not contribute.
        row0 = (c * blocks_per_shard + j) * tile_rows
        row_ids = jax.lax.broadcasted_iota(jnp.int32, (tile_rows, LANES), 0) + row0
        valid = (gt > EPS) & (row_ids < nrows_ref[0])

        # log() of masked-out lanes may be -inf/NaN; the select below discards
        # them (select does not propagate NaN), so no "safe" pre-clamp needed.
        diff = jnp.abs(jnp.log(gt) - pred)
        diff = jnp.where(valid, diff, 0.0)
        cnt = jnp.where(valid, 1.0, 0.0)

        # Reduce rows in groups of 8 so the accumulator stays one (8,128) vreg:
        # steady state is pure VPU adds, hidden under the DMA.
        acc_sum[...] += jnp.sum(diff.reshape(r8, SUBLANES, LANES), axis=0)
        acc_cnt[...] += jnp.sum(cnt.reshape(r8, SUBLANES, LANES), axis=0)

        @pl.when(j == pl.num_programs(1) - 1)
        def _():
            sum_ref[0] = acc_sum[...]
            cnt_ref[0] = acc_cnt[...]

    return kernel


def log_depth_l1_loss(pred, gt, eps=EPS):
    assert pred.shape == gt.shape
    pred_f = pred.reshape(-1)
    gt_f = gt.reshape(-1)
    n = pred_f.shape[0]

    # Only the (rare, <128 element) ragged tail is padded; gt pads are 0.0 so
    # the eps mask excludes them.  No chunk-sized padding pass over HBM.
    n128 = _round_up(n, LANES)
    if n128 != n:
        pred_f = jnp.pad(pred_f, (0, n128 - n))
        gt_f = jnp.pad(gt_f, (0, n128 - n))

    rows = n128 // LANES
    pred2d = pred_f.reshape(rows, LANES)
    gt2d = gt_f.reshape(rows, LANES)

    tile_rows = min(MAX_TILE_ROWS, _round_up(rows, SUBLANES))
    num_blocks = (rows + tile_rows - 1) // tile_rows
    num_shards = 2 if num_blocks >= 2 else 1          # both TCs on v7x
    bps = (num_blocks + num_shards - 1) // num_shards  # blocks per shard

    kernel = _make_kernel(tile_rows, bps)

    # Clamp the block index so shards with a trailing out-of-range block stay
    # in-bounds; the in-kernel row mask (which uses the *unclamped* index)
    # zeroes any such block's contribution.
    def in_map(c, j, nrows):
        return (jnp.minimum(c * bps + j, num_blocks - 1), 0)

    in_spec = pl.BlockSpec((tile_rows, LANES), in_map)
    out_spec = pl.BlockSpec((1, SUBLANES, LANES), lambda c, j, nrows: (c, 0, 0))

    sums, cnts = pl.pallas_call(
        kernel,
        out_shape=(
            jax.ShapeDtypeStruct((num_shards, SUBLANES, LANES), jnp.float32),
            jax.ShapeDtypeStruct((num_shards, SUBLANES, LANES), jnp.float32),
        ),
        grid_spec=pltpu.PrefetchScalarGridSpec(
            num_scalar_prefetch=1,
            grid=(num_shards, bps),
            in_specs=[in_spec, in_spec],
            out_specs=[out_spec, out_spec],
            scratch_shapes=[
                pltpu.VMEM((SUBLANES, LANES), jnp.float32),
                pltpu.VMEM((SUBLANES, LANES), jnp.float32),
            ],
        ),
        compiler_params=pltpu.CompilerParams(
            dimension_semantics=("parallel", "arbitrary"),
        ),
    )(jnp.array([rows], dtype=jnp.int32), pred2d, gt2d)

    total = jnp.sum(sums)
    count = jnp.sum(cnts)
    # Mean over masked elements (0/0 = NaN if the mask is empty, matching torch).
    return (total / count).astype(jnp.float32)


def _reference(pred, gt, eps=EPS):
    mask = gt > eps
    safe_gt = jnp.where(mask, gt, jnp.ones_like(gt))
    diff = jnp.where(mask, jnp.abs(jnp.log(safe_gt) - pred), 0.0)
    return jnp.sum(diff) / jnp.sum(mask.astype(jnp.float32))


if __name__ == "__main__":
    key = jax.random.PRNGKey(0)
    kp, kg = jax.random.split(key)

    shape = (2, 4, 16, 16)  # NCHW
    pred = jax.random.normal(kp, shape, dtype=jnp.float32)
    # gt: mix of valid depths (>eps) and invalid (<=eps, incl. negatives/zeros)
    gt = jax.random.uniform(kg, shape, dtype=jnp.float32, minval=-0.3, maxval=2.0)

    out = log_depth_l1_loss(pred, gt)
    jax.block_until_ready(out)

    ref = _reference(pred, gt)
    assert jnp.allclose(out, ref, rtol=1e-5, atol=1e-6), (out, ref)

    print("KERNEL_OK")
</pallas_src>

<mosaic_0001>
module attributes {stable_mosaic.version = 11 : i64} {
  func.func @kernel(%arg0: i32, %arg1: i32, %arg2: memref<1xi32, #tpu.memory_space<smem>>, %arg3: memref<16x128xf32, #tpu.memory_space<vmem>>, %arg4: memref<16x128xf32, #tpu.memory_space<vmem>>, %arg5: memref<1x8x128xf32, #tpu.memory_space<vmem>>, %arg6: memref<1x8x128xf32, #tpu.memory_space<vmem>>, %arg7: memref<8x128xf32, #tpu.memory_space<vmem>>, %arg8: memref<8x128xf32, #tpu.memory_space<vmem>>) attributes {dimension_semantics = [#tpu.dimension_semantics<parallel>, #tpu.dimension_semantics<arbitrary>], iteration_bounds = array<i64: 1, 1>, scalar_prefetch = 1 : i64, scratch_operands = 2 : i64, tpu.core_type = #tpu.core_type<tc>, window_params = [{transform_indices = @transform_0, window_bounds = array<i64: 16, 128>}, {transform_indices = @transform_1, window_bounds = array<i64: 16, 128>}, {transform_indices = @transform_2, window_bounds = array<i64: 1, 8, 128>}, {transform_indices = @transform_3, window_bounds = array<i64: 1, 8, 128>}]} {
    %c0_i32 = arith.constant 0 : i32
    %0 = arith.cmpi eq, %arg1, %c0_i32 : i32
    %1 = arith.extui %0 : i1 to i32
    %c0_i32_0 = arith.constant 0 : i32
    %2 = arith.cmpi ne, %1, %c0_i32_0 : i32
    scf.if %2 {
      %cst_20 = arith.constant 0.000000e+00 : f32
      %38 = vector.broadcast %cst_20 : f32 to vector<8x128xf32>
      %c0_21 = arith.constant 0 : index
      %c0_22 = arith.constant 0 : index
      %39 = vector.load %arg7[%c0_21, %c0_22] : memref<8x128xf32, #tpu.memory_space<vmem>>, vector<8x128xf32>
      tpu.vector_store %arg7[%c0_21, %c0_22], %38 {strides = array<i32>} : memref<8x128xf32, #tpu.memory_space<vmem>>, vector<8x128xf32>,
      %cst_23 = arith.constant 0.000000e+00 : f32
      %40 = vector.broadcast %cst_23 : f32 to vector<8x128xf32>
      %c0_24 = arith.constant 0 : index
      %c0_25 = arith.constant 0 : index
      %41 = vector.load %arg8[%c0_24, %c0_25] : memref<8x128xf32, #tpu.memory_space<vmem>>, vector<8x128xf32>
      tpu.vector_store %arg8[%c0_24, %c0_25], %40 {strides = array<i32>} : memref<8x128xf32, #tpu.memory_space<vmem>>, vector<8x128xf32>,
    } else {
    }
    %c0 = arith.constant 0 : index
    %c0_1 = arith.constant 0 : index
    %3 = vector.load %arg4[%c0, %c0_1] : memref<16x128xf32, #tpu.memory_space<vmem>>, vector<16x128xf32>
    %c0_2 = arith.constant 0 : index
    %c0_3 = arith.constant 0 : index
    %4 = vector.load %arg3[%c0_2, %c0_3] : memref<16x128xf32, #tpu.memory_space<vmem>>, vector<16x128xf32>
    %c1_i32 = arith.constant 1 : i32
    %5 = arith.muli %arg0, %c1_i32 : i32
    %6 = arith.addi %5, %arg1 : i32
    %c16_i32 = arith.constant 16 : i32
    %7 = arith.muli %6, %c16_i32 : i32
    %8 = tpu.iota {dimensions = array<i32: 0>} : vector<16x128xi32>
    %9 = vector.broadcast %7 : i32 to vector<16x128xi32>
    %10 = arith.addi %8, %9 : vector<16x128xi32>
    %cst = arith.constant 9.99999974E-6 : f32
    %11 = vector.broadcast %cst : f32 to vector<16x128xf32>
    %12 = arith.cmpf ogt, %3, %11 : vector<16x128xf32>
    %c0_4 = arith.constant 0 : index
    %13 = memref.load %arg2[%c0_4] : memref<1xi32, #tpu.memory_space<smem>>
    %14 = vector.broadcast %13 : i32 to vector<16x128xi32>
    %15 = arith.cmpi slt, %10, %14 : vector<16x128xi32>
    %16 = arith.andi %12, %15 : vector<16x128xi1>
    %17 = math.log %3 : vector<16x128xf32>
    %18 = arith.subf %17, %4 : vector<16x128xf32>
    %19 = math.absf %18 : vector<16x128xf32>
    %cst_5 = arith.constant 0.000000e+00 : f32
    %20 = vector.broadcast %cst_5 : f32 to vector<16x128xf32>
    %21 = arith.select %16, %19, %20 : vector<16x128xi1>, vector<16x128xf32>
    %cst_6 = arith.constant 1.000000e+00 : f32
    %cst_7 = arith.constant 0.000000e+00 : f32
    %22 = vector.broadcast %cst_6 : f32 to vector<16x128xf32>
    %23 = vector.broadcast %cst_7 : f32 to vector<16x128xf32>
    %24 = arith.select %16, %22, %23 : vector<16x128xi1>, vector<16x128xf32>
    %c0_8 = arith.constant 0 : index
    %c0_9 = arith.constant 0 : index
    %25 = vector.load %arg7[%c0_8, %c0_9] : memref<8x128xf32, #tpu.memory_space<vmem>>, vector<8x128xf32>
    %26 = vector.shape_cast %21 : vector<16x128xf32> to vector<2x8x128xf32>
    %cst_10 = arith.constant dense<0.000000e+00> : vector<8x128xf32>
    %27 = vector.multi_reduction <add>, %26, %cst_10 [0] : vector<2x8x128xf32> to vector<8x128xf32>
    %28 = arith.addf %25, %27 : vector<8x128xf32>
    %c0_11 = arith.constant 0 : index
    %c0_12 = arith.constant 0 : index
    %29 = vector.load %arg7[%c0_11, %c0_12] : memref<8x128xf32, #tpu.memory_space<vmem>>, vector<8x128xf32>
    tpu.vector_store %arg7[%c0_11, %c0_12], %28 {strides = array<i32>} : memref<8x128xf32, #tpu.memory_space<vmem>>, vector<8x128xf32>,
    %c0_13 = arith.constant 0 : index
    %c0_14 = arith.constant 0 : index
    %30 = vector.load %arg8[%c0_13, %c0_14] : memref<8x128xf32, #tpu.memory_space<vmem>>, vector<8x128xf32>
    %31 = vector.shape_cast %24 : vector<16x128xf32> to vector<2x8x128xf32>
    %cst_15 = arith.constant dense<0.000000e+00> : vector<8x128xf32>
    %32 = vector.multi_reduction <add>, %31, %cst_15 [0] : vector<2x8x128xf32> to vector<8x128xf32>
    %33 = arith.addf %30, %32 : vector<8x128xf32>
    %c0_16 = arith.constant 0 : index
    %c0_17 = arith.constant 0 : index
    %34 = vector.load %arg8[%c0_16, %c0_17] : memref<8x128xf32, #tpu.memory_space<vmem>>, vector<8x128xf32>
    tpu.vector_store %arg8[%c0_16, %c0_17], %33 {strides = array<i32>} : memref<8x128xf32, #tpu.memory_space<vmem>>, vector<8x128xf32>,
    %c0_i32_18 = arith.constant 0 : i32
    %35 = arith.cmpi eq, %arg1, %c0_i32_18 : i32
    %36 = arith.extui %35 : i1 to i32
    %c0_i32_19 = arith.constant 0 : i32
    %37 = arith.cmpi ne, %36, %c0_i32_19 : i32
    scf.if %37 {
      %c0_20 = arith.constant 0 : index
      %c0_21 = arith.constant 0 : index
      %38 = vector.load %arg7[%c0_20, %c0_21] : memref<8x128xf32, #tpu.memory_space<vmem>>, vector<8x128xf32>
      %c0_22 = arith.constant 0 : index
      %c0_23 = arith.constant 0 : index
      %c0_24 = arith.constant 0 : index
      %39 = vector.load %arg5[%c0_22, %c0_23, %c0_24] : memref<1x8x128xf32, #tpu.memory_space<vmem>>, vector<1x8x128xf32>
      %40 = vector.shape_cast %39 : vector<1x8x128xf32> to vector<8x128xf32>
      %41 = vector.shape_cast %38 : vector<8x128xf32> to vector<1x8x128xf32>
      tpu.vector_store %arg5[%c0_22, %c0_23, %c0_24], %41 {strides = array<i32>} : memref<1x8x128xf32, #tpu.memory_space<vmem>>, vector<1x8x128xf32>,
      %c0_25 = arith.constant 0 : index
      %c0_26 = arith.constant 0 : index
      %42 = vector.load %arg8[%c0_25, %c0_26] : memref<8x128xf32, #tpu.memory_space<vmem>>, vector<8x128xf32>
      %c0_27 = arith.constant 0 : index
      %c0_28 = arith.constant 0 : index
      %c0_29 = arith.constant 0 : index
      %43 = vector.load %arg6[%c0_27, %c0_28, %c0_29] : memref<1x8x128xf32, #tpu.memory_space<vmem>>, vector<1x8x128xf32>
      %44 = vector.shape_cast %43 : vector<1x8x128xf32> to vector<8x128xf32>
      %45 = vector.shape_cast %42 : vector<8x128xf32> to vector<1x8x128xf32>
      tpu.vector_store %arg6[%c0_27, %c0_28, %c0_29], %45 {strides = array<i32>} : memref<1x8x128xf32, #tpu.memory_space<vmem>>, vector<1x8x128xf32>,
    } else {
    }
    return
  }
  func.func @transform_0(%arg0: i32, %arg1: i32, %arg2: memref<1xi32, #tpu.memory_space<smem>>) -> (i32, i32) {
    %c1_i32 = arith.constant 1 : i32
    %0 = arith.muli %arg0, %c1_i32 : i32
    %1 = arith.addi %0, %arg1 : i32
    %c0_i32 = arith.constant 0 : i32
    %2 = arith.minsi %1, %c0_i32 : i32
    %c0_i32_0 = arith.constant 0 : i32
    %c0_i32_1 = arith.constant 0 : i32
    return %2, %c0_i32_0 : i32, i32
  }
  func.func @transform_1(%arg0: i32, %arg1: i32, %arg2: memref<1xi32, #tpu.memory_space<smem>>) -> (i32, i32) {
    %c1_i32 = arith.constant 1 : i32
    %0 = arith.muli %arg0, %c1_i32 : i32
    %1 = arith.addi %0, %arg1 : i32
    %c0_i32 = arith.constant 0 : i32
    %2 = arith.minsi %1, %c0_i32 : i32
    %c0_i32_0 = arith.constant 0 : i32
    %c0_i32_1 = arith.constant 0 : i32
    return %2, %c0_i32_0 : i32, i32
  }
  func.func @transform_2(%arg0: i32, %arg1: i32, %arg2: memref<1xi32, #tpu.memory_space<smem>>) -> (i32, i32, i32) {
    %c0_i32 = arith.constant 0 : i32
    %c0_i32_0 = arith.constant 0 : i32
    %c0_i32_1 = arith.constant 0 : i32
    return %arg0, %c0_i32, %c0_i32_0 : i32, i32, i32
  }
  func.func @transform_3(%arg0: i32, %arg1: i32, %arg2: memref<1xi32, #tpu.memory_space<smem>>) -> (i32, i32, i32) {
    %c0_i32 = arith.constant 0 : i32
    %c0_i32_0 = arith.constant 0 : i32
    %c0_i32_1 = arith.constant 0 : i32
    return %arg0, %c0_i32, %c0_i32_0 : i32, i32, i32
  }
}

</mosaic_0001>

<bundles_post_ra>
// kernel: tpu_custom_call.1
= control target key start
LH: loop header
LB: loop body
LE: loop exit
PB: predicated region body
PF: predicated region fallthrough
CT: control target
= control target key end

     0   :  { %11 = vsyncpa [#allocation7], 0  ;;  %s338_s0 = inlined_call_operand.<no memory space> [shape: s32[1], index: 0, kind: input, shape index: {}]   ;;  %s339_s1 = inlined_call_operand.hbm [shape: f32[16,128], index: 1, kind: input, shape index: {}]   ;;  %s340_s2 = inlined_call_operand.hbm [shape: f32[16,128], index: 2, kind: input, shape index: {}]   ;;  %s341_s3 = inlined_call_operand.hbm [shape: f32[1,8,128], index: 3, kind: output, shape index: {0}]   ;;  %s342_s4 = inlined_call_operand.hbm [shape: f32[1,8,128], index: 4, kind: output, shape index: {1}]  }
   0x1   :  { %12 = vsyncpa [#allocation10], 0 }
   0x2   :  { %13 = vsyncpa [#allocation8], 0 }
   0x3   :  { %14 = vsyncpa [#allocation13], 0  ;;  %s25_s17 = sshll.u32 %s339_s1, 4  ;;  %s275_s18 = smov [#allocation6]   ;;  %s26_s17 = int_to_ptr.hbm [resolvable:$true] %s25_s17 }
   0x4   :  { %s27_s19 = sshll.u32 %s275_s18, 4  ;;  %s44_s22 = sshll.u32 %s340_s2, 4  ;;  %s28_s19 = int_to_ptr.vmem [resolvable:$true] %s27_s19  ;;  %s45_s22 = int_to_ptr.hbm [resolvable:$true] %s44_s22 }
   0x5   :  { %s276_s23 = smov 128   ;;  %s277_s24 = smov 8  }
   0x6   :  { %33 = dma.hbm_to_vmem [thread:$0]  %s26_s17, 256, %s28_s19, [#allocation7], %s276_s23, %s276_s23, %s277_s24  }
   0x7   :  { %s278_s25 = smov [#allocation9]  }
   0x8   :  { %s46_s26 = sshll.u32 %s278_s25, 4  ;;  %s47_s26 = int_to_ptr.vmem [resolvable:$true] %s46_s26 }
   0x9   :  { %52 = dma.hbm_to_vmem [thread:$0]  %s45_s22, 256, %s47_s26, [#allocation10], %s276_s23, %s276_s23, %s277_s24  }
   0xa   :  { %267 = dma.done.wait [#allocation7], 256  }
   0xb   :  { %268 = vsyncadd [#allocation7], 4294967040 }
   0xc   :  { %269 = dma.done.wait [#allocation10], 256  }
   0xd   :  { %270 = vsyncadd [#allocation10], 4294967040  ;;  %v81_v0 = vlaneseq  ;;  %v90_v2 = vstv %s338_s0  ;;  %v75_v4 = vld [vmem:[#allocation9] sm:$0xff]  ;;  %v76_v5 = vld [vmem:[#allocation9 + $0x8] sm:$0xff]  ;;  %s279_s2 = smov [#allocation12]   ;;  %s140_s5 = sshll.u32 %s342_s4, 4  ;;  %s141_s5 = int_to_ptr.hbm [resolvable:$true] %s140_s5 }
   0xe   :  { %vm87_vm2 = vcmp.gt.f32.partialorder %v75_v4, 1e-05  ;;  %vm88_vm3 = vcmp.gt.f32.partialorder %v76_v5, 1e-05  ;;  %167 = vlog2.f32 %v75_v4  ;;  %s138_s28 = sshll.u32 %s279_s2, 4  ;;  %v280_v8 = vmov 0.0   ;;  %s139_s28 = int_to_ptr.vmem [resolvable:$true] %s138_s28 }
   0xf   :  { %v82_v1 = vshrl.u32 %v81_v0, 7  ;;  %169 = vlog2.f32 %v76_v5  ;;  %v77_v13 = vld [vmem:[#allocation6] sm:$0xff]  ;;  %v78_v15 = vld [vmem:[#allocation6 + $0x8] sm:$0xff]  ;;  %s281_s0 = smov [#allocation11]   ;;  %s129_s8 = sshll.u32 %s341_s3, 4  ;;  %s130_s8 = int_to_ptr.hbm [resolvable:$true] %s129_s8 }
  0x10   :  { %s127_s4 = sshll.u32 %s281_s0, 4  ;;  %s128_s4 = int_to_ptr.vmem [resolvable:$true] %s127_s4 }
  0x11   :  { %v83_v3 = vadd.s32 8, %v82_v1  ;;  %vm91_vm0 = vcmp.lt.s32.totalorder %v82_v1, %v90_v2 }
  0x12   :  { %vm316_vm4 = vmand %vm87_vm2, %vm91_vm0 }
  0x13   :  { %vm92_vm1 = vcmp.lt.s32.totalorder %v83_v3, %v90_v2  ;;  %v105_v9 = vsel %vm316_vm4, 1.0, %v280_v8 }
  0x14   :  { %vm323_vm5 = vmand %vm88_vm3, %vm92_vm1  ;;  %v168_v12 = vpop.eup %167 }
  0x15   :  { %v106_v10 = vsel %vm323_vm5, 1.0, %v280_v8  ;;  %v170_v14 = vpop.eup %169  ;;  %v96_v16 = vmul.f32 0.6931472, %v168_v12 }
  0x16   :  { %v112_v11 = vadd.f32 %v106_v10, %v105_v9  ;;  %v98_v17 = vmul.f32 0.6931472, %v170_v14 }
  0x17   :  { %v99_v18 = vsub.f32 %v96_v16, %v77_v13 }
  0x18   :  { %121 = vst [vmem:[#allocation12] sm:$0xff] %v112_v11  ;;  %v100_v19 = vsub.f32 %v98_v17, %v78_v15 }
  0x19   :  { %143 = dma.vmem_to_hbm [thread:$0]  %s139_s28, 128, %s141_s5, [#allocation13]   ;;  %v101_v20 = vand.u32 2147483647, %v99_v18 }
  0x1a   :  { %v102_v21 = vand.u32 2147483647, %v100_v19 }
  0x1b   :  { %v103_v22 = vsel %vm316_vm4, %v101_v20, 0.0 }
  0x1c   :  { %v104_v23 = vsel %vm323_vm5, %v102_v21, 0.0 }
  0x1d   :  { %v108_v24 = vadd.f32 %v104_v23, %v103_v22 }
  0x1f   :  { %119 = vst [vmem:[#allocation11] sm:$0xff] %v108_v24 }
  0x20   :  { %132 = dma.vmem_to_hbm [thread:$0]  %s128_s4, 128, %s130_s8, [#allocation8]  }
  0x21   :  { %271 = dma.done.wait [#allocation8], 128  }
  0x22   :  { %272 = vsyncadd [#allocation8], 4294967168 }
  0x23   :  { %273 = dma.done.wait [#allocation13], 128  }
  0x24   :  { %274 = vsyncadd [#allocation13], 4294967168 }
  0x25   :  { %152 = vsyncpa [#allocation7], 1 }
  0x26   :  { %153 = vsyncpa [#allocation10], 1 }
  0x27   :  { %154 = vsyncpa [#allocation8], 1 }
  0x28   :  { %155 = vsyncpa [#allocation13], 1 }

</bundles_post_ra>
